<compile_context>
chip_gen: v7x
topology: tpu7x:2x2x1
jax: 0.10.0
libtpu: 0.0.40
codegen_flags: <defaults>
</compile_context>

<pallas_src>
import jax
import jax.numpy as jnp
from jax.experimental import pallas as pl
from jax.experimental.pallas import tpu as pltpu

SUBLANE = 8


def _round_up(x, m):
    return (x + m - 1) // m * m


def _pick_tile(total, candidates, min_blocks=1):
    """Largest candidate tile that divides `total` and yields >= min_blocks blocks."""
    for c in candidates:
        if total % c == 0 and total // c >= min_blocks:
            return c
    return total


# ----------------------------------------------------------------------------
# Pallas kernels
# ----------------------------------------------------------------------------
def _conv_matmul_relu_kernel(p_ref, w_ref, b_ref, o_ref):
    # p: (TILE_M, Cin*9) bf16 ; w: (Cin*9, Cout) bf16 (resident) ; b: (1, Cout) f32
    acc = jnp.dot(p_ref[...], w_ref[...], preferred_element_type=jnp.float32)
    o_ref[...] = jnp.maximum(acc + b_ref[...], 0.0).astype(o_ref.dtype)


def _linear_ktiled_kernel(x_ref, w_ref, b_ref, o_ref, acc_ref):
    # Feature (reduction) axis is the grid axis; accumulate in f32 VMEM scratch.
    k = pl.program_id(0)

    @pl.when(k == 0)
    def _():
        acc_ref[...] = jnp.zeros_like(acc_ref)

    acc_ref[...] += jnp.dot(x_ref[...], w_ref[...], preferred_element_type=jnp.float32)

    @pl.when(k == pl.num_programs(0) - 1)
    def _():
        o_ref[...] = (acc_ref[...] + b_ref[...]).astype(o_ref.dtype)


# ----------------------------------------------------------------------------
# pallas_call wrappers
# ----------------------------------------------------------------------------
def _conv_matmul_relu(patches, w_mat, b_row, out_dtype):
    m, k = patches.shape
    n = w_mat.shape[1]
    tile_m = _pick_tile(m, (1024, 512, 256, 128, 64, 32, 16, 8), min_blocks=2)
    return pl.pallas_call(
        _conv_matmul_relu_kernel,
        out_shape=jax.ShapeDtypeStruct((m, n), out_dtype),
        grid_spec=pltpu.PrefetchScalarGridSpec(
            num_scalar_prefetch=0,
            grid=(m // tile_m,),
            in_specs=[
                pl.BlockSpec((tile_m, k), lambda i: (i, 0)),
                pl.BlockSpec((k, n), lambda i: (0, 0)),   # weight resident across M tiles
                pl.BlockSpec((1, n), lambda i: (0, 0)),   # bias resident
            ],
            out_specs=pl.BlockSpec((tile_m, n), lambda i: (i, 0)),
        ),
        compiler_params=pltpu.CompilerParams(
            dimension_semantics=("parallel",),            # shard M over TCs on v7x
        ),
    )(patches, w_mat, b_row)


def _linear_ktiled(x, w_mat, b_row, out_dtype):
    bp, f = x.shape
    n = w_mat.shape[1]
    tile_k = _pick_tile(f, (8192, 4096, 2048, 1024, 512, 256, 128))
    return pl.pallas_call(
        _linear_ktiled_kernel,
        out_shape=jax.ShapeDtypeStruct((bp, n), out_dtype),
        grid_spec=pltpu.PrefetchScalarGridSpec(
            num_scalar_prefetch=0,
            grid=(f // tile_k,),
            in_specs=[
                pl.BlockSpec((bp, tile_k), lambda k: (0, k)),
                pl.BlockSpec((tile_k, n), lambda k: (k, 0)),
                pl.BlockSpec((1, n), lambda k: (0, 0)),
            ],
            out_specs=pl.BlockSpec((bp, n), lambda k: (0, 0)),
            scratch_shapes=[pltpu.VMEM((bp, n), jnp.float32)],
        ),
        compiler_params=pltpu.CompilerParams(
            dimension_semantics=("arbitrary",),           # reduction axis
        ),
    )(x, w_mat, b_row)


# ----------------------------------------------------------------------------
# Parameters (PyTorch layout) + one-time matmul-ready preparation
# ----------------------------------------------------------------------------
def init_params(key, cin, cout, h, w, num_classes, dtype=jnp.float32):
    k1, k2, k3, k4 = jax.random.split(key, 4)
    feature_dim = cout * h * w
    conv_w = jax.random.normal(k1, (cout, cin, 3, 3), dtype) * 0.1
    conv_b = jax.random.normal(k2, (cout,), dtype) * 0.1
    fc_w = jax.random.normal(k3, (num_classes, feature_dim), dtype) * 0.05
    fc_b = jax.random.normal(k4, (num_classes,), dtype) * 0.05
    return dict(conv_w=conv_w, conv_b=conv_b, fc_w=fc_w, fc_b=fc_b)


def prepare_params(params, h, w):
    """One-time conversion of PyTorch-layout weights into bf16, matmul-ready
    operands at their NATURAL (unpadded) sizes (hoisted out of the forward path)."""
    conv_w = params["conv_w"]                                # (Cout, Cin, 3, 3)
    cout, cin, kh, kw = conv_w.shape
    fc_w = params["fc_w"]                                    # (n_cls, Cout*H*W)
    num_classes = fc_w.shape[0]

    # Conv weight: (Cin*9, Cout), K ordered (cin, kh, kw) to match im2col.
    w_mat = conv_w.reshape(cout, cin * kh * kw).T.astype(jnp.bfloat16)
    conv_b = params["conv_b"].astype(jnp.float32).reshape(1, cout)

    # Classifier weight permuted from NCHW-flatten order (c, h, w) to the
    # NHWC-flatten order (h, w, c) emitted by the conv kernel, so the forward
    # path needs no transpose between the two kernels.
    fc = fc_w.reshape(num_classes, cout, h, w).transpose(2, 3, 1, 0)   # (H, W, Cout, n)
    fc_mat = fc.reshape(h * w * cout, num_classes).astype(jnp.bfloat16)
    fc_b = params["fc_b"].astype(jnp.float32).reshape(1, num_classes)

    return dict(conv_w_mat=w_mat, conv_b_row=conv_b,
                fc_w_mat=fc_mat, fc_b_row=fc_b)


def _im2col(x_nchw):
    """(B, C, H, W) -> bf16 patches (B*H*W, C*9); K ordered (c, kh, kw)."""
    b, c, h, w = x_nchw.shape
    xp = jnp.pad(x_nchw.astype(jnp.bfloat16), ((0, 0), (0, 0), (1, 1), (1, 1)))
    shards = [xp[:, :, kh:kh + h, kw:kw + w] for kh in range(3) for kw in range(3)]
    patches = jnp.stack(shards, axis=2)                     # (B, C, 9, H, W)
    patches = patches.reshape(b, c * 9, h, w)
    patches = patches.transpose(0, 2, 3, 1)                 # (B, H, W, C*9)
    return patches.reshape(b * h * w, c * 9)


# ----------------------------------------------------------------------------
# Forward
# ----------------------------------------------------------------------------
@jax.jit
def icarl_forward(prep, x_nchw):
    b, _, h, w = x_nchw.shape
    cout = prep["conv_w_mat"].shape[1]
    num_classes = prep["fc_w_mat"].shape[1]

    # Feature extractor: 3x3 same-conv + ReLU as a gridded im2col matmul.
    # TODO(synk): for very large inputs the 9x im2col expansion could be moved
    # inside the kernel with a halo-tile DMA to cut HBM reads further.
    patches = _im2col(x_nchw)                                           # (B*H*W, Cin*9) bf16
    conv_out = _conv_matmul_relu(patches, prep["conv_w_mat"],
                                 prep["conv_b_row"], jnp.bfloat16)      # (B*H*W, Cout)

    # Flatten: contiguous row-major (b, h, w, c) ordering -> pure metadata
    # reshape; classifier weight was permuted to match, so no transpose /
    # extra HBM pass is required.
    feats = conv_out.reshape(b, h * w * cout)
    b_pad = max(_round_up(b, SUBLANE), SUBLANE)
    if b_pad != b:
        feats = jnp.pad(feats, ((0, b_pad - b), (0, 0)))

    logits = _linear_ktiled(feats, prep["fc_w_mat"], prep["fc_b_row"],
                            jnp.float32)                                # (B_pad, n_cls)
    return logits[:b].astype(x_nchw.dtype)


# TODO(synk): expand_classifier / update_old_model / exemplar_sets are training-time
# bookkeeping (parameter resizing, deep copies) with no kernel-level compute; only
# the forward pass is implemented here.


if __name__ == "__main__":
    B, CIN, H, W = 2, 4, 16, 16
    COUT, NUM_CLASSES = 8, 10

    key = jax.random.PRNGKey(0)
    kp, kx = jax.random.split(key)
    params = init_params(kp, CIN, COUT, H, W, NUM_CLASSES)
    prep = prepare_params(params, H, W)
    x = jax.random.normal(kx, (B, CIN, H, W), jnp.float32)

    logits = icarl_forward(prep, x)
    jax.block_until_ready(logits)
    assert logits.shape == (B, NUM_CLASSES)
    print("KERNEL_OK")
</pallas_src>

<mosaic_0001>
module attributes {stable_mosaic.version = 11 : i64} {
  func.func @_conv_matmul_relu_kernel(%arg0: i32, %arg1: memref<256x36xbf16, #tpu.memory_space<vmem>>, %arg2: memref<36x8xbf16, #tpu.memory_space<vmem>>, %arg3: memref<1x8xf32, #tpu.memory_space<vmem>>, %arg4: memref<256x8xbf16, #tpu.memory_space<vmem>>) attributes {dimension_semantics = [#tpu.dimension_semantics<parallel>], iteration_bounds = array<i64: 2>, scalar_prefetch = 0 : i64, scratch_operands = 0 : i64, tpu.core_type = #tpu.core_type<tc>, window_params = [{transform_indices = @transform_0, window_bounds = array<i64: 256, 36>}, {pipeline_mode = #tpu.pipeline_mode<synchronous>, transform_indices = @transform_1, window_bounds = array<i64: 36, 8>}, {pipeline_mode = #tpu.pipeline_mode<synchronous>, transform_indices = @transform_2, window_bounds = array<i64: 1, 8>}, {transform_indices = @transform_3, window_bounds = array<i64: 256, 8>}]} {
    %c0 = arith.constant 0 : index
    %c0_0 = arith.constant 0 : index
    %0 = vector.load %arg1[%c0, %c0_0] : memref<256x36xbf16, #tpu.memory_space<vmem>>, vector<256x36xbf16>
    %c0_1 = arith.constant 0 : index
    %c0_2 = arith.constant 0 : index
    %1 = vector.load %arg2[%c0_1, %c0_2] : memref<36x8xbf16, #tpu.memory_space<vmem>>, vector<36x8xbf16>
    %cst = arith.constant dense<0.000000e+00> : vector<256x8xf32>
    %2 = tpu.matmul %0, %1, %cst {dimension_numbers = #tpu.dot_dimension_numbers<[1], [0], [0], [1], [0, 0, 1, 1], [], []>} : vector<256x36xbf16>, vector<36x8xbf16>, vector<256x8xf32> -> vector<256x8xf32>
    %c0_3 = arith.constant 0 : index
    %c0_4 = arith.constant 0 : index
    %3 = vector.load %arg3[%c0_3, %c0_4] : memref<1x8xf32, #tpu.memory_space<vmem>>, vector<1x8xf32>
    %4 = vector.broadcast %3 : vector<1x8xf32> to vector<256x8xf32>
    %5 = arith.addf %2, %4 : vector<256x8xf32>
    %cst_5 = arith.constant 0.000000e+00 : f32
    %6 = vector.broadcast %cst_5 : f32 to vector<256x8xf32>
    %7 = arith.maximumf %5, %6 : vector<256x8xf32>
    %8 = arith.truncf %7 : vector<256x8xf32> to vector<256x8xbf16>
    %c0_6 = arith.constant 0 : index
    %c0_7 = arith.constant 0 : index
    %9 = vector.load %arg4[%c0_6, %c0_7] : memref<256x8xbf16, #tpu.memory_space<vmem>>, vector<256x8xbf16>
    tpu.vector_store %arg4[%c0_6, %c0_7], %8 {strides = array<i32>} : memref<256x8xbf16, #tpu.memory_space<vmem>>, vector<256x8xbf16>,
    return
  }
  func.func @transform_0(%arg0: i32) -> (i32, i32) {
    %c0_i32 = arith.constant 0 : i32
    %c0_i32_0 = arith.constant 0 : i32
    return %arg0, %c0_i32 : i32, i32
  }
  func.func @transform_1(%arg0: i32) -> (i32, i32) {
    %c0_i32 = arith.constant 0 : i32
    %c0_i32_0 = arith.constant 0 : i32
    %c0_i32_1 = arith.constant 0 : i32
    return %c0_i32, %c0_i32_0 : i32, i32
  }
  func.func @transform_2(%arg0: i32) -> (i32, i32) {
    %c0_i32 = arith.constant 0 : i32
    %c0_i32_0 = arith.constant 0 : i32
    %c0_i32_1 = arith.constant 0 : i32
    return %c0_i32, %c0_i32_0 : i32, i32
  }
  func.func @transform_3(%arg0: i32) -> (i32, i32) {
    %c0_i32 = arith.constant 0 : i32
    %c0_i32_0 = arith.constant 0 : i32
    return %arg0, %c0_i32 : i32, i32
  }
}

module attributes {stable_mosaic.version = 11 : i64} {
  func.func @_linear_ktiled_kernel(%arg0: i32, %arg1: memref<8x2048xbf16, #tpu.memory_space<vmem>>, %arg2: memref<2048x10xbf16, #tpu.memory_space<vmem>>, %arg3: memref<1x10xf32, #tpu.memory_space<vmem>>, %arg4: memref<8x10xf32, #tpu.memory_space<vmem>>, %arg5: memref<8x10xf32, #tpu.memory_space<vmem>>) attributes {dimension_semantics = [#tpu.dimension_semantics<arbitrary>], iteration_bounds = array<i64: 1>, scalar_prefetch = 0 : i64, scratch_operands = 1 : i64, tpu.core_type = #tpu.core_type<tc>, window_params = [{transform_indices = @transform_0, window_bounds = array<i64: 8, 2048>}, {transform_indices = @transform_1, window_bounds = array<i64: 2048, 10>}, {pipeline_mode = #tpu.pipeline_mode<synchronous>, transform_indices = @transform_2, window_bounds = array<i64: 1, 10>}, {pipeline_mode = #tpu.pipeline_mode<synchronous>, transform_indices = @transform_3, window_bounds = array<i64: 8, 10>}]} {
    %c0_i32 = arith.constant 0 : i32
    %0 = arith.cmpi eq, %arg0, %c0_i32 : i32
    %1 = arith.extui %0 : i1 to i32
    %c0_i32_0 = arith.constant 0 : i32
    %2 = arith.cmpi ne, %1, %c0_i32_0 : i32
    scf.if %2 {
      %cst_10 = arith.constant 0.000000e+00 : f32
      %12 = vector.broadcast %cst_10 : f32 to vector<8x10xf32>
      %c0_11 = arith.constant 0 : index
      %c0_12 = arith.constant 0 : index
      %13 = vector.load %arg5[%c0_11, %c0_12] : memref<8x10xf32, #tpu.memory_space<vmem>>, vector<8x10xf32>
      tpu.vector_store %arg5[%c0_11, %c0_12], %12 {strides = array<i32>} : memref<8x10xf32, #tpu.memory_space<vmem>>, vector<8x10xf32>,
    } else {
    }
    %c0 = arith.constant 0 : index
    %c0_1 = arith.constant 0 : index
    %3 = vector.load %arg5[%c0, %c0_1] : memref<8x10xf32, #tpu.memory_space<vmem>>, vector<8x10xf32>
    %c0_2 = arith.constant 0 : index
    %c0_3 = arith.constant 0 : index
    %4 = vector.load %arg1[%c0_2, %c0_3] : memref<8x2048xbf16, #tpu.memory_space<vmem>>, vector<8x2048xbf16>
    %c0_4 = arith.constant 0 : index
    %c0_5 = arith.constant 0 : index
    %5 = vector.load %arg2[%c0_4, %c0_5] : memref<2048x10xbf16, #tpu.memory_space<vmem>>, vector<2048x10xbf16>
    %cst = arith.constant dense<0.000000e+00> : vector<8x10xf32>
    %6 = tpu.matmul %4, %5, %cst {dimension_numbers = #tpu.dot_dimension_numbers<[1], [0], [0], [1], [0, 0, 1, 1], [], []>} : vector<8x2048xbf16>, vector<2048x10xbf16>, vector<8x10xf32> -> vector<8x10xf32>
    %7 = arith.addf %3, %6 : vector<8x10xf32>
    %c0_6 = arith.constant 0 : index
    %c0_7 = arith.constant 0 : index
    %8 = vector.load %arg5[%c0_6, %c0_7] : memref<8x10xf32, #tpu.memory_space<vmem>>, vector<8x10xf32>
    tpu.vector_store %arg5[%c0_6, %c0_7], %7 {strides = array<i32>} : memref<8x10xf32, #tpu.memory_space<vmem>>, vector<8x10xf32>,
    %c0_i32_8 = arith.constant 0 : i32
    %9 = arith.cmpi eq, %arg0, %c0_i32_8 : i32
    %10 = arith.extui %9 : i1 to i32
    %c0_i32_9 = arith.constant 0 : i32
    %11 = arith.cmpi ne, %10, %c0_i32_9 : i32
    scf.if %11 {
      %c0_10 = arith.constant 0 : index
      %c0_11 = arith.constant 0 : index
      %12 = vector.load %arg5[%c0_10, %c0_11] : memref<8x10xf32, #tpu.memory_space<vmem>>, vector<8x10xf32>
      %c0_12 = arith.constant 0 : index
      %c0_13 = arith.constant 0 : index
      %13 = vector.load %arg3[%c0_12, %c0_13] : memref<1x10xf32, #tpu.memory_space<vmem>>, vector<1x10xf32>
      %14 = vector.broadcast %13 : vector<1x10xf32> to vector<8x10xf32>
      %15 = arith.addf %12, %14 : vector<8x10xf32>
      %c0_14 = arith.constant 0 : index
      %c0_15 = arith.constant 0 : index
      %16 = vector.load %arg4[%c0_14, %c0_15] : memref<8x10xf32, #tpu.memory_space<vmem>>, vector<8x10xf32>
      tpu.vector_store %arg4[%c0_14, %c0_15], %15 {strides = array<i32>} : memref<8x10xf32, #tpu.memory_space<vmem>>, vector<8x10xf32>,
    } else {
    }
    return
  }
  func.func @transform_0(%arg0: i32) -> (i32, i32) {
    %c0_i32 = arith.constant 0 : i32
    %c0_i32_0 = arith.constant 0 : i32
    return %c0_i32, %arg0 : i32, i32
  }
  func.func @transform_1(%arg0: i32) -> (i32, i32) {
    %c0_i32 = arith.constant 0 : i32
    %c0_i32_0 = arith.constant 0 : i32
    return %arg0, %c0_i32 : i32, i32
  }
  func.func @transform_2(%arg0: i32) -> (i32, i32) {
    %c0_i32 = arith.constant 0 : i32
    %c0_i32_0 = arith.constant 0 : i32
    %c0_i32_1 = arith.constant 0 : i32
    return %c0_i32, %c0_i32_0 : i32, i32
  }
  func.func @transform_3(%arg0: i32) -> (i32, i32) {
    %c0_i32 = arith.constant 0 : i32
    %c0_i32_0 = arith.constant 0 : i32
    %c0_i32_1 = arith.constant 0 : i32
    return %c0_i32, %c0_i32_0 : i32, i32
  }
}

</mosaic_0001>

<bundles_post_ra>
// kernel: icarl_forward.2
= control target key start
LH: loop header
LB: loop body
LE: loop exit
PB: predicated region body
PF: predicated region fallthrough
CT: control target
= control target key end

     0   :  { %s1008_s12 = smov 0   ;;  %s1178_s0 = inlined_call_operand.vmem [shape: bf16[512,36], index: 0, kind: input, shape index: {}]   ;;  %s1179_s1 = inlined_call_operand.vmem [shape: bf16[36,8], index: 1, kind: input, shape index: {}]   ;;  %s1180_s2 = inlined_call_operand.vmem [shape: f32[1,8], index: 2, kind: input, shape index: {}]   ;;  %s1181_s3 = inlined_call_operand.vmem [shape: bf16[512,8], index: 3, kind: output, shape index: {}]  }
   0x1 LB: > { %s777_s13 = sadd.s32 4294967295, %s986_s12   ;;  %p781_p0 = scmp.ge.s32.totalorder %s986_s12, 1  ;;  %s986_s12 = sphi %s1008_s12, %s13_s12  }
   0x2   : > { %p138_p1 = scmp.lt.s32.totalorder %s986_s12, 3 }
   0x4   : > { %p139_p2 = pnand %p781_p0, %p138_p1 }
   0x5   : > { %v961_v0 = vld [vmem:[%s1179_s1] sm:$0xff] (!%p139_p2)   ;;  %v962_v1 = vld [vmem:[%s1179_s1 + $0x8] sm:$0xff] (!%p139_p2)   ;;  %s782_s18 = sshll.u32 (!%p139_p2), %s777_s13, 5  ;;  %v963_v2 = vld [vmem:[%s1179_s1 + $0x10] ss:$0 sps:$4 sm:$0x33] (!%p139_p2)  }
   0x6   : > { %142 = sbr.rel (%p139_p2) target bundleno = 265 (0x109), region = 32  ;;  %907 = vmatprep.subr.bf16.mxu0 (!%p139_p2), %v961_v0  ;;  %945 = vmatprep.subr.bf16.mxu1 (!%p139_p2), %v961_v0  ;;  %p163_p3 = scmp.lt.s32.totalorder (!%p139_p2), %s782_s18, 63  ;;  %vm363_vm0 = vcmask (!%p139_p2), 1041408   ;;  %vm314_vm1 = vcmask (!%p139_p2), 293888   ;;  %v1070_v20 = vld [vmem:[%s1180_s2] ss:$0 sm:$0xff] (!%p139_p2) }
   0x7   : > { %908 = vmatpush3.bf16.msra.mxu0 (!%p139_p2), %v961_v0  ;;  %948 = vmatpush3.bf16.msra.mxu1 (!%p139_p2), %v961_v0  ;;  %v365_v3 = vsel (!%p139_p2), %vm363_vm0, %v963_v2, 0  ;;  %vm688_vm2 = vcmask (!%p139_p2), 60416  }
   0x8   : > { %909 = vmatprep.subr.bf16.mxu0 (!%p139_p2), %v962_v1  ;;  %946 = vmatprep.subr.bf16.mxu1 (!%p139_p2), %v962_v1 }
   0xb   : > { %910 = vmatpush3.bf16.msra.mxu0 (!%p139_p2), %v962_v1  ;;  %949 = vmatpush3.bf16.msra.mxu1 (!%p139_p2), %v962_v1 }
   0xc   : > { %951 = vmatprep.subr.msk.bf16.mxu0 (!%p139_p2), %vm363_vm0, %v963_v2  ;;  %952 = vmatprep.subr.msk.bf16.mxu1 (!%p139_p2), %vm363_vm0, %v963_v2 }
   0xd   : > { %s1183_s18 = smov (!%p163_p3, %s782_s18), 63 }
   0xe   : > { %s783_s21 = sshll.u32 %s1183_s18, 2 }
   0xf   : > { %s1033_s24 = scalar_lea.vmem %s1178_s0, %s783_s21  ;;  %912 = vmatpush3.bf16.msra.mxu0 %v365_v3  ;;  %950 = vmatpush3.bf16.msra.mxu1 %v365_v3  ;;  %s1083_s29 = scalar_lea.vmem %s1181_s3, %s783_s21 }
  0x10   : > { %v964_v4 = vld [vmem:[%s1033_s24] sm:$0xff]   ;;  %v966_v6 = vld [vmem:[%s1033_s24 + $0x8] sm:$0xff]   ;;  %v968_v8 = vld [vmem:[%s1033_s24 + $0x10] sm:$0xff]  }
  0x11   : > { %v965_v5 = vld [vmem:[%s1033_s24 + $0x40] sm:$0xff]   ;;  %913 = vmatprep.mubr.msk.bf16.mxu0 %vm314_vm1, %v964_v4  ;;  %v967_v7 = vld [vmem:[%s1033_s24 + $0x48] sm:$0xff]   ;;  %v969_v9 = vld [vmem:[%s1033_s24 + $0x50] sm:$0xff]  }
  0x12   : > { %929 = vmatprep.mubr.msk.bf16.mxu1 %vm314_vm1, %v965_v5  ;;  %914 = vmatmul.mubr.msk.bf16.vlgmr.msra.gmra.mrb[0].mxu0 %vm314_vm1, %v966_v6  ;;  %v970_v10 = vld [vmem:[%s1033_s24 + $0x18] sm:$0xff]   ;;  %v972_v12 = vld [vmem:[%s1033_s24 + $0x20] sm:$0xff]   ;;  %v974_v14 = vld [vmem:[%s1033_s24 + $0x28] sm:$0xff]  }
  0x13   : > { %930 = vmatmul.mubr.msk.bf16.vlgmr.msra.gmra.mrb[0].mxu1 %vm314_vm1, %v967_v7  ;;  %917 = vmatprep.mubr.msk.bf16.mxu0 %vm314_vm1, %v968_v8  ;;  %v971_v11 = vld [vmem:[%s1033_s24 + $0x58] sm:$0xff]   ;;  %v973_v13 = vld [vmem:[%s1033_s24 + $0x60] sm:$0xff]   ;;  %v975_v15 = vld [vmem:[%s1033_s24 + $0x68] sm:$0xff]  }
  0x14   : > { %933 = vmatprep.mubr.msk.bf16.mxu1 %vm314_vm1, %v969_v9  ;;  %v976_v16 = vld [vmem:[%s1033_s24 + $0x30] sm:$0xff]   ;;  %v978_v18 = vld [vmem:[%s1033_s24 + $0x38] sm:$0xff]  }
  0x15   : > { %v977_v17 = vld [vmem:[%s1033_s24 + $0x70] sm:$0xff]   ;;  %v979_v19 = vld [vmem:[%s1033_s24 + $0x78] sm:$0xff]  }
  0x1a   : > { %918 = vmatmul.mubr.msk.bf16.gmra.mrb[4].mxu0 %vm314_vm1, %v970_v10 }
  0x1b   : > { %934 = vmatmul.mubr.msk.bf16.gmra.mrb[4].mxu1 %vm314_vm1, %v971_v11  ;;  %921 = vmatprep.mubr.msk.bf16.mxu0 %vm314_vm1, %v972_v12 }
  0x1c   : > { %937 = vmatprep.mubr.msk.bf16.mxu1 %vm314_vm1, %v973_v13 }
  0x22   : > { %922 = vmatmul.mubr.msk.bf16.gmra.mrb[8].mxu0 %vm314_vm1, %v974_v14 }
  0x23   : > { %938 = vmatmul.mubr.msk.bf16.gmra.mrb[8].mxu1 %vm314_vm1, %v975_v15  ;;  %925 = vmatprep.mubr.msk.bf16.mxu0 %vm314_vm1, %v976_v16 }
  0x24   : > { %941 = vmatprep.mubr.msk.bf16.mxu1 %vm314_vm1, %v977_v17 }
  0x2a   : > { %926 = vmatmul.mubr.msk.bf16.gmra.mrb[12].mxu0 %vm314_vm1, %v978_v18 }
  0x2b   : > { %942 = vmatmul.mubr.msk.bf16.gmra.mrb[12].mxu1 %vm314_vm1, %v979_v19 }
  0xe5   : > { %v915_v21 = vpop.f32.mrb[0].mxu0 }
  0xe6   : > { %v931_v22 = vpop.f32.mrb[0].mxu1  ;;  %v410_v23 = vadd.f32 %v915_v21, %v1070_v20  ;;  %v401_v25 = vpop.f32.mrb[1].mxu0 }
  0xe7   : > { %v474_v24 = vadd.f32 %v931_v22, %v1070_v20  ;;  %v465_v26 = vpop.f32.mrb[1].mxu1  ;;  %v402_v27 = vadd.f32 %v1070_v20, %v401_v25  ;;  %v916_v29 = vpop.f32.mrb[2].mxu0 }
  0xe8   : > { %v466_v28 = vadd.f32 %v1070_v20, %v465_v26  ;;  %v932_v30 = vpop.f32.mrb[2].mxu1  ;;  %v530_v31 = vmax.f32 %v410_v23, 0.0  ;;  %v413_v33 = vadd.f32 %v916_v29, %v1070_v20  ;;  %v404_v35 = vpop.f32.mrb[3].mxu0 }
  0xe9   : > { %v546_v32 = vmax.f32 %v474_v24, 0.0  ;;  %v477_v34 = vadd.f32 %v932_v30, %v1070_v20  ;;  %v468_v36 = vpop.f32.mrb[3].mxu1  ;;  %v528_v37 = vmax.f32 %v402_v27, 0.0  ;;  %v405_v39 = vadd.f32 %v1070_v20, %v404_v35 }
  0xea   : > { %v544_v38 = vmax.f32 %v466_v28, 0.0  ;;  %v469_v40 = vadd.f32 %v1070_v20, %v468_v36  ;;  %v858_v41 = vpack.c.bf16 %v530_v31, %v530_v31  ;;  %v531_v43 = vmax.f32 %v413_v33, 0.0 }
  0xeb   : > { %v874_v42 = vpack.c.bf16 %v546_v32, %v546_v32  ;;  %v547_v44 = vmax.f32 %v477_v34, 0.0  ;;  %v856_v45 = vpack.c.bf16 %v528_v37, %v528_v37  ;;  %v529_v47 = vmax.f32 %v405_v39, 0.0 }
  0xec   : > { %v872_v46 = vpack.c.bf16 %v544_v38, %v544_v38  ;;  %v545_v48 = vmax.f32 %v469_v40, 0.0  ;;  %691 = vst.msk [vmem:[%s1083_s29 + $0x8] sm:$0xf] %vm688_vm2, %v858_v41  ;;  %v859_v49 = vpack.c.bf16 %v531_v43, %v531_v43 }
  0xed   : > { %707 = vst.msk [vmem:[%s1083_s29 + $0x48] sm:$0xf] %vm688_vm2, %v874_v42  ;;  %v875_v50 = vpack.c.bf16 %v547_v44, %v547_v44  ;;  %689 = vst.msk [vmem:[%s1083_s29] sm:$0xf] %vm688_vm2, %v856_v45  ;;  %v857_v51 = vpack.c.bf16 %v529_v47, %v529_v47  ;;  %v919_v53 = vpop.f32.mrb[4].mxu0 }
  0xee   : > { %705 = vst.msk [vmem:[%s1083_s29 + $0x40] sm:$0xf] %vm688_vm2, %v872_v46  ;;  %v873_v52 = vpack.c.bf16 %v545_v48, %v545_v48  ;;  %v935_v54 = vpop.f32.mrb[4].mxu1  ;;  %692 = vst.msk [vmem:[%s1083_s29 + $0xc] sm:$0xf] %vm688_vm2, %v859_v49  ;;  %v426_v55 = vadd.f32 %v919_v53, %v1070_v20  ;;  %v417_v57 = vpop.f32.mrb[5].mxu0 }
  0xef   : > { %708 = vst.msk [vmem:[%s1083_s29 + $0x4c] sm:$0xf] %vm688_vm2, %v875_v50  ;;  %v490_v56 = vadd.f32 %v935_v54, %v1070_v20  ;;  %v481_v58 = vpop.f32.mrb[5].mxu1  ;;  %690 = vst.msk [vmem:[%s1083_s29 + $0x4] sm:$0xf] %vm688_vm2, %v857_v51  ;;  %v418_v59 = vadd.f32 %v1070_v20, %v417_v57  ;;  %v920_v61 = vpop.f32.mrb[6].mxu0 }
  0xf0   : > { %706 = vst.msk [vmem:[%s1083_s29 + $0x44] sm:$0xf] %vm688_vm2, %v873_v52  ;;  %v482_v60 = vadd.f32 %v1070_v20, %v481_v58  ;;  %v936_v62 = vpop.f32.mrb[6].mxu1  ;;  %v534_v63 = vmax.f32 %v426_v55, 0.0  ;;  %v429_v1 = vadd.f32 %v920_v61, %v1070_v20  ;;  %v420_v3 = vpop.f32.mrb[7].mxu0 }
  0xf1   : > { %v550_v0 = vmax.f32 %v490_v56, 0.0  ;;  %v493_v2 = vadd.f32 %v936_v62, %v1070_v20  ;;  %v484_v4 = vpop.f32.mrb[7].mxu1  ;;  %v532_v5 = vmax.f32 %v418_v59, 0.0  ;;  %v421_v7 = vadd.f32 %v1070_v20, %v420_v3 }
  0xf2   : > { %v548_v6 = vmax.f32 %v482_v60, 0.0  ;;  %v485_v8 = vadd.f32 %v1070_v20, %v484_v4  ;;  %v862_v9 = vpack.c.bf16 %v534_v63, %v534_v63  ;;  %v535_v11 = vmax.f32 %v429_v1, 0.0 }
  0xf3   : > { %v878_v10 = vpack.c.bf16 %v550_v0, %v550_v0  ;;  %v551_v12 = vmax.f32 %v493_v2, 0.0  ;;  %v860_v13 = vpack.c.bf16 %v532_v5, %v532_v5  ;;  %v533_v15 = vmax.f32 %v421_v7, 0.0 }
  0xf4   : > { %v876_v14 = vpack.c.bf16 %v548_v6, %v548_v6  ;;  %v549_v16 = vmax.f32 %v485_v8, 0.0  ;;  %695 = vst.msk [vmem:[%s1083_s29 + $0x18] sm:$0xf] %vm688_vm2, %v862_v9  ;;  %v863_v17 = vpack.c.bf16 %v535_v11, %v535_v11 }
  0xf5   : > { %711 = vst.msk [vmem:[%s1083_s29 + $0x58] sm:$0xf] %vm688_vm2, %v878_v10  ;;  %v879_v18 = vpack.c.bf16 %v551_v12, %v551_v12  ;;  %693 = vst.msk [vmem:[%s1083_s29 + $0x10] sm:$0xf] %vm688_vm2, %v860_v13  ;;  %v861_v19 = vpack.c.bf16 %v533_v15, %v533_v15  ;;  %v923_v22 = vpop.f32.mrb[8].mxu0 }
  0xf6   : > { %709 = vst.msk [vmem:[%s1083_s29 + $0x50] sm:$0xf] %vm688_vm2, %v876_v14  ;;  %v877_v21 = vpack.c.bf16 %v549_v16, %v549_v16  ;;  %v939_v23 = vpop.f32.mrb[8].mxu1  ;;  %696 = vst.msk [vmem:[%s1083_s29 + $0x1c] sm:$0xf] %vm688_vm2, %v863_v17  ;;  %v442_v24 = vadd.f32 %v923_v22, %v1070_v20  ;;  %v433_v26 = vpop.f32.mrb[9].mxu0 }
  0xf7   : > { %712 = vst.msk [vmem:[%s1083_s29 + $0x5c] sm:$0xf] %vm688_vm2, %v879_v18  ;;  %v506_v25 = vadd.f32 %v939_v23, %v1070_v20  ;;  %v497_v27 = vpop.f32.mrb[9].mxu1  ;;  %694 = vst.msk [vmem:[%s1083_s29 + $0x14] sm:$0xf] %vm688_vm2, %v861_v19  ;;  %v434_v28 = vadd.f32 %v1070_v20, %v433_v26  ;;  %v924_v30 = vpop.f32.mrb[10].mxu0 }
  0xf8   : > { %710 = vst.msk [vmem:[%s1083_s29 + $0x54] sm:$0xf] %vm688_vm2, %v877_v21  ;;  %v498_v29 = vadd.f32 %v1070_v20, %v497_v27  ;;  %v940_v31 = vpop.f32.mrb[10].mxu1  ;;  %v538_v32 = vmax.f32 %v442_v24, 0.0  ;;  %v445_v34 = vadd.f32 %v924_v30, %v1070_v20  ;;  %v436_v36 = vpop.f32.mrb[11].mxu0 }
  0xf9   : > { %v554_v33 = vmax.f32 %v506_v25, 0.0  ;;  %v509_v35 = vadd.f32 %v940_v31, %v1070_v20  ;;  %v500_v37 = vpop.f32.mrb[11].mxu1  ;;  %v536_v38 = vmax.f32 %v434_v28, 0.0  ;;  %v437_v40 = vadd.f32 %v1070_v20, %v436_v36 }
  0xfa   : > { %v552_v39 = vmax.f32 %v498_v29, 0.0  ;;  %v501_v41 = vadd.f32 %v1070_v20, %v500_v37  ;;  %v866_v42 = vpack.c.bf16 %v538_v32, %v538_v32  ;;  %v539_v44 = vmax.f32 %v445_v34, 0.0 }
  0xfb   : > { %v882_v43 = vpack.c.bf16 %v554_v33, %v554_v33  ;;  %v555_v45 = vmax.f32 %v509_v35, 0.0  ;;  %v864_v46 = vpack.c.bf16 %v536_v38, %v536_v38  ;;  %v537_v48 = vmax.f32 %v437_v40, 0.0 }
  0xfc   : > { %v880_v47 = vpack.c.bf16 %v552_v39, %v552_v39  ;;  %v553_v49 = vmax.f32 %v501_v41, 0.0  ;;  %699 = vst.msk [vmem:[%s1083_s29 + $0x28] sm:$0xf] %vm688_vm2, %v866_v42  ;;  %v867_v50 = vpack.c.bf16 %v539_v44, %v539_v44 }
  0xfd   : > { %715 = vst.msk [vmem:[%s1083_s29 + $0x68] sm:$0xf] %vm688_vm2, %v882_v43  ;;  %v883_v51 = vpack.c.bf16 %v555_v45, %v555_v45  ;;  %697 = vst.msk [vmem:[%s1083_s29 + $0x20] sm:$0xf] %vm688_vm2, %v864_v46  ;;  %v865_v52 = vpack.c.bf16 %v537_v48, %v537_v48  ;;  %v927_v54 = vpop.f32.mrb[12].mxu0 }
  0xfe   : > { %713 = vst.msk [vmem:[%s1083_s29 + $0x60] sm:$0xf] %vm688_vm2, %v880_v47  ;;  %v881_v53 = vpack.c.bf16 %v553_v49, %v553_v49  ;;  %v943_v55 = vpop.f32.mrb[12].mxu1  ;;  %700 = vst.msk [vmem:[%s1083_s29 + $0x2c] sm:$0xf] %vm688_vm2, %v867_v50  ;;  %v458_v56 = vadd.f32 %v927_v54, %v1070_v20  ;;  %v449_v58 = vpop.f32.mrb[13].mxu0 }
  0xff   : > { %716 = vst.msk [vmem:[%s1083_s29 + $0x6c] sm:$0xf] %vm688_vm2, %v883_v51  ;;  %v522_v57 = vadd.f32 %v943_v55, %v1070_v20  ;;  %v513_v59 = vpop.f32.mrb[13].mxu1  ;;  %698 = vst.msk [vmem:[%s1083_s29 + $0x24] sm:$0xf] %vm688_vm2, %v865_v52  ;;  %v450_v60 = vadd.f32 %v1070_v20, %v449_v58  ;;  %v928_v62 = vpop.f32.mrb[14].mxu0 }
 0x100   : > { %714 = vst.msk [vmem:[%s1083_s29 + $0x64] sm:$0xf] %vm688_vm2, %v881_v53  ;;  %v514_v61 = vadd.f32 %v1070_v20, %v513_v59  ;;  %v944_v63 = vpop.f32.mrb[14].mxu1  ;;  %v542_v0 = vmax.f32 %v458_v56, 0.0  ;;  %v461_v2 = vadd.f32 %v928_v62, %v1070_v20  ;;  %v452_v4 = vpop.f32.mrb[15].mxu0 }
 0x101   : > { %v558_v1 = vmax.f32 %v522_v57, 0.0  ;;  %v525_v3 = vadd.f32 %v944_v63, %v1070_v20  ;;  %v516_v5 = vpop.f32.mrb[15].mxu1  ;;  %v540_v6 = vmax.f32 %v450_v60, 0.0  ;;  %v453_v8 = vadd.f32 %v1070_v20, %v452_v4 }
 0x102   : > { %v556_v7 = vmax.f32 %v514_v61, 0.0  ;;  %v517_v9 = vadd.f32 %v1070_v20, %v516_v5  ;;  %v870_v10 = vpack.c.bf16 %v542_v0, %v542_v0  ;;  %v543_v12 = vmax.f32 %v461_v2, 0.0 }
 0x103   : > { %v886_v11 = vpack.c.bf16 %v558_v1, %v558_v1  ;;  %v559_v13 = vmax.f32 %v525_v3, 0.0  ;;  %v868_v14 = vpack.c.bf16 %v540_v6, %v540_v6  ;;  %v541_v16 = vmax.f32 %v453_v8, 0.0 }
 0x104   : > { %v884_v15 = vpack.c.bf16 %v556_v7, %v556_v7  ;;  %v557_v17 = vmax.f32 %v517_v9, 0.0  ;;  %703 = vst.msk [vmem:[%s1083_s29 + $0x38] sm:$0xf] %vm688_vm2, %v870_v10  ;;  %v871_v18 = vpack.c.bf16 %v543_v12, %v543_v12 }
 0x105   : > { %719 = vst.msk [vmem:[%s1083_s29 + $0x78] sm:$0xf] %vm688_vm2, %v886_v11  ;;  %v887_v19 = vpack.c.bf16 %v559_v13, %v559_v13  ;;  %701 = vst.msk [vmem:[%s1083_s29 + $0x30] sm:$0xf] %vm688_vm2, %v868_v14  ;;  %v869_v20 = vpack.c.bf16 %v541_v16, %v541_v16 }
 0x106   : > { %717 = vst.msk [vmem:[%s1083_s29 + $0x70] sm:$0xf] %vm688_vm2, %v884_v15  ;;  %v885_v21 = vpack.c.bf16 %v557_v17, %v557_v17  ;;  %704 = vst.msk [vmem:[%s1083_s29 + $0x3c] sm:$0xf] %vm688_vm2, %v871_v18 }
 0x107   : > { %720 = vst.msk [vmem:[%s1083_s29 + $0x7c] sm:$0xf] %vm688_vm2, %v887_v19  ;;  %702 = vst.msk [vmem:[%s1083_s29 + $0x34] sm:$0xf] %vm688_vm2, %v869_v20 }
 0x108   : > { %718 = vst.msk [vmem:[%s1083_s29 + $0x74] sm:$0xf] %vm688_vm2, %v885_v21 }
 0x109 PF: > { %s13_s12 = sadd.s32 1, %s986_s12  }
 0x10a   : > { %p10_p4 = scmp.ge.s32.totalorder %s13_s12, 4  }
 0x10c   :  { %12 = sbr.rel (!%p10_p4) target bundleno = 1 (0x1), region = 62 }

// kernel: icarl_forward.3
= control target key start
LH: loop header
LB: loop body
LE: loop exit
PB: predicated region body
PF: predicated region fallthrough
CT: control target
= control target key end

     0   :  { %vm19_vm0 = vcmask 80896   ;;  %s2354_s1 = inlined_call_operand.vmem [shape: bf16[2048,10], index: 1, kind: input, shape index: {}]   ;;  %s2355_s0 = inlined_call_operand.vmem [shape: bf16[8,2048], index: 0, kind: input, shape index: {}]   ;;  %s2356_s2 = inlined_call_operand.vmem [shape: f32[1,10], index: 2, kind: input, shape index: {}]   ;;  %s2357_s3 = inlined_call_operand.vmem [shape: f32[8,10], index: 3, kind: output, shape index: {}]  }
   0x1   :  { %v1772_v0 = vld [vmem:[%s2354_s1 + $0x40] sm:$0xff]   ;;  %v1776_v4 = vld [vmem:[%s2354_s1 + $0x48] sm:$0xff]   ;;  %v1780_v8 = vld [vmem:[%s2354_s1 + $0x50] sm:$0xff]  }
   0x2   :  { %v1773_v1 = vld [vmem:[%s2354_s1 + $0xc0] sm:$0xff]   ;;  %1595 = vmatprep.subr.bf16.mxu0 %v1772_v0  ;;  %v1777_v5 = vld [vmem:[%s2354_s1 + $0xc8] sm:$0xff]   ;;  %v1781_v9 = vld [vmem:[%s2354_s1 + $0xd0] sm:$0xff]  }
   0x3   :  { %v1774_v2 = vld [vmem:[%s2354_s1] sm:$0xff]   ;;  %1617 = vmatprep.subr.bf16.mxu1 %v1773_v1  ;;  %v1778_v6 = vld [vmem:[%s2354_s1 + $0x8] sm:$0xff]   ;;  %v1782_v10 = vld [vmem:[%s2354_s1 + $0x10] sm:$0xff]  }
   0x4   :  { %v1775_v3 = vld [vmem:[%s2354_s1 + $0x80] sm:$0xff]   ;;  %1596 = vmatpush3.bf16.msra.mxu0 %v1774_v2  ;;  %v1779_v7 = vld [vmem:[%s2354_s1 + $0x88] sm:$0xff]   ;;  %v1783_v11 = vld [vmem:[%s2354_s1 + $0x90] sm:$0xff]  }
   0x5   :  { %1618 = vmatpush3.bf16.msra.mxu1 %v1775_v3  ;;  %1597 = vmatprep.subr.bf16.mxu0 %v1776_v4  ;;  %v1784_v12 = vld [vmem:[%s2354_s1 + $0x58] sm:$0xff]   ;;  %v1788_v16 = vld [vmem:[%s2354_s1 + $0x60] sm:$0xff]   ;;  %v1792_v20 = vld [vmem:[%s2354_s1 + $0x68] sm:$0xff]  }
   0x6   :  { %1619 = vmatprep.subr.bf16.mxu1 %v1777_v5  ;;  %v1785_v13 = vld [vmem:[%s2354_s1 + $0xd8] sm:$0xff]   ;;  %v1789_v17 = vld [vmem:[%s2354_s1 + $0xe0] sm:$0xff]   ;;  %v1793_v21 = vld [vmem:[%s2354_s1 + $0xe8] sm:$0xff]  }
   0x7   :  { %v1786_v14 = vld [vmem:[%s2354_s1 + $0x18] sm:$0xff]   ;;  %v1790_v18 = vld [vmem:[%s2354_s1 + $0x20] sm:$0xff]   ;;  %v1794_v22 = vld [vmem:[%s2354_s1 + $0x28] sm:$0xff]  }
   0x8   :  { %1598 = vmatpush3.bf16.msra.mxu0 %v1778_v6  ;;  %v1787_v15 = vld [vmem:[%s2354_s1 + $0x98] sm:$0xff]   ;;  %v1791_v19 = vld [vmem:[%s2354_s1 + $0xa0] sm:$0xff]   ;;  %v1795_v23 = vld [vmem:[%s2354_s1 + $0xa8] sm:$0xff]  }
   0x9   :  { %1620 = vmatpush3.bf16.msra.mxu1 %v1779_v7  ;;  %1599 = vmatprep.subr.bf16.mxu0 %v1780_v8  ;;  %v1796_v24 = vld [vmem:[%s2354_s1 + $0x70] sm:$0xff]   ;;  %v1800_v28 = vld [vmem:[%s2354_s1 + $0x78] sm:$0xff]   ;;  %v22_v32 = vld [vmem:[%s2355_s0] sm:$0xff] }
   0xa   :  { %1621 = vmatprep.subr.bf16.mxu1 %v1781_v9  ;;  %v1797_v25 = vld [vmem:[%s2354_s1 + $0xf0] sm:$0xff]   ;;  %v1801_v29 = vld [vmem:[%s2354_s1 + $0xf8] sm:$0xff]   ;;  %v23_v33 = vld [vmem:[%s2355_s0 + $0x8] sm:$0xff]  ;;  %v1450_v34 = vcombine.low %v22_v32, %v22_v32  ;;  %v1451_v35 = vcombine.high %v22_v32, %v22_v32 }
   0xb   :  { %v1798_v26 = vld [vmem:[%s2354_s1 + $0x30] sm:$0xff]   ;;  %v1802_v30 = vld [vmem:[%s2354_s1 + $0x38] sm:$0xff]   ;;  %v1452_v36 = vcombine.low %v23_v33, %v23_v33  ;;  %v1453_v37 = vcombine.high %v23_v33, %v23_v33  ;;  %v1808_v38 = vld [vmem:[%s2354_s1 + $0x140] sm:$0xff]  }
   0xc   :  { %1600 = vmatpush3.bf16.msra.mxu0 %v1782_v10  ;;  %v1799_v27 = vld [vmem:[%s2354_s1 + $0xb0] sm:$0xff]   ;;  %v1803_v31 = vld [vmem:[%s2354_s1 + $0xb8] sm:$0xff]   ;;  %v1809_v39 = vld [vmem:[%s2354_s1 + $0x1c0] sm:$0xff]   ;;  %1142 = vmatprep.mubr.bf16.mxu0 %v1451_v35 }
   0xd   :  { %1622 = vmatpush3.bf16.msra.mxu1 %v1783_v11  ;;  %1601 = vmatprep.subr.bf16.mxu0 %v1784_v12  ;;  %v1810_v40 = vld [vmem:[%s2354_s1 + $0x100] sm:$0xff]   ;;  %v1812_v42 = vld [vmem:[%s2354_s1 + $0x148] sm:$0xff]   ;;  %v1816_v46 = vld [vmem:[%s2354_s1 + $0x150] sm:$0xff]  }
   0xe   :  { %1623 = vmatprep.subr.bf16.mxu1 %v1785_v13  ;;  %1182 = vmatprep.mubr.bf16.mxu1 %v1453_v37  ;;  %v1811_v41 = vld [vmem:[%s2354_s1 + $0x180] sm:$0xff]   ;;  %v1813_v43 = vld [vmem:[%s2354_s1 + $0x1c8] sm:$0xff]   ;;  %v1817_v47 = vld [vmem:[%s2354_s1 + $0x1d0] sm:$0xff]  }
   0xf   :  { %v1814_v44 = vld [vmem:[%s2354_s1 + $0x108] sm:$0xff]   ;;  %v1818_v48 = vld [vmem:[%s2354_s1 + $0x110] sm:$0xff]   ;;  %v1820_v50 = vld [vmem:[%s2354_s1 + $0x158] sm:$0xff]  }
  0x10   :  { %1602 = vmatpush3.bf16.msra.mxu0 %v1786_v14  ;;  %v1815_v45 = vld [vmem:[%s2354_s1 + $0x188] sm:$0xff]   ;;  %v1819_v49 = vld [vmem:[%s2354_s1 + $0x190] sm:$0xff]   ;;  %v1821_v51 = vld [vmem:[%s2354_s1 + $0x1d8] sm:$0xff]  }
  0x11   :  { %1624 = vmatpush3.bf16.msra.mxu1 %v1787_v15  ;;  %1603 = vmatprep.subr.bf16.mxu0 %v1788_v16  ;;  %v1822_v52 = vld [vmem:[%s2354_s1 + $0x118] sm:$0xff]   ;;  %v1824_v54 = vld [vmem:[%s2354_s1 + $0x160] sm:$0xff]   ;;  %v1828_v58 = vld [vmem:[%s2354_s1 + $0x168] sm:$0xff]  }
  0x12   :  { %1625 = vmatprep.subr.bf16.mxu1 %v1789_v17  ;;  %v1823_v53 = vld [vmem:[%s2354_s1 + $0x198] sm:$0xff]   ;;  %v1825_v55 = vld [vmem:[%s2354_s1 + $0x1e0] sm:$0xff]   ;;  %v1829_v59 = vld [vmem:[%s2354_s1 + $0x1e8] sm:$0xff]  }
  0x13   :  { %v1826_v56 = vld [vmem:[%s2354_s1 + $0x120] sm:$0xff]   ;;  %v1830_v60 = vld [vmem:[%s2354_s1 + $0x128] sm:$0xff]   ;;  %v1832_v62 = vld [vmem:[%s2354_s1 + $0x170] sm:$0xff]  }
  0x14   :  { %1604 = vmatpush3.bf16.msra.mxu0 %v1790_v18  ;;  %v1827_v57 = vld [vmem:[%s2354_s1 + $0x1a0] sm:$0xff]   ;;  %v1831_v61 = vld [vmem:[%s2354_s1 + $0x1a8] sm:$0xff]   ;;  %v1833_v63 = vld [vmem:[%s2354_s1 + $0x1f0] sm:$0xff]  }
  0x15   :  { %1626 = vmatpush3.bf16.msra.mxu1 %v1791_v19  ;;  %1605 = vmatprep.subr.bf16.mxu0 %v1792_v20  ;;  %v1834_v0 = vld [vmem:[%s2354_s1 + $0x130] sm:$0xff]   ;;  %v1836_v2 = vld [vmem:[%s2354_s1 + $0x178] sm:$0xff]   ;;  %v1844_v12 = vld [vmem:[%s2354_s1 + $0x240] sm:$0xff]  }
  0x16   :  { %1627 = vmatprep.subr.bf16.mxu1 %v1793_v21  ;;  %v1835_v1 = vld [vmem:[%s2354_s1 + $0x1b0] sm:$0xff]   ;;  %v1837_v3 = vld [vmem:[%s2354_s1 + $0x1f8] sm:$0xff]   ;;  %v1845_v13 = vld [vmem:[%s2354_s1 + $0x2c0] sm:$0xff]  }
  0x17   :  { %v1838_v4 = vld [vmem:[%s2354_s1 + $0x138] sm:$0xff]   ;;  %v24_v6 = vld [vmem:[%s2355_s0 + $0x10] sm:$0xff]  ;;  %v1846_v14 = vld [vmem:[%s2354_s1 + $0x200] sm:$0xff]  }
  0x18   :  { %1606 = vmatpush3.bf16.msra.mxu0 %v1794_v22  ;;  %v1839_v5 = vld [vmem:[%s2354_s1 + $0x1b8] sm:$0xff]   ;;  %v1454_v7 = vcombine.low %v24_v6, %v24_v6  ;;  %v1455_v8 = vcombine.high %v24_v6, %v24_v6  ;;  %v1847_v15 = vld [vmem:[%s2354_s1 + $0x280] sm:$0xff]   ;;  %v1848_v16 = vld [vmem:[%s2354_s1 + $0x248] sm:$0xff]  }
  0x19   :  { %1628 = vmatpush3.bf16.msra.mxu1 %v1795_v23  ;;  %1607 = vmatprep.subr.bf16.mxu0 %v1796_v24  ;;  %v25_v9 = vld [vmem:[%s2355_s0 + $0x18] sm:$0xff]  ;;  %v1849_v17 = vld [vmem:[%s2354_s1 + $0x2c8] sm:$0xff]   ;;  %v1852_v20 = vld [vmem:[%s2354_s1 + $0x250] sm:$0xff]  }
  0x1a   :  { %1629 = vmatprep.subr.bf16.mxu1 %v1797_v25  ;;  %v1456_v10 = vcombine.low %v25_v9, %v25_v9  ;;  %v1457_v11 = vcombine.high %v25_v9, %v25_v9  ;;  %v1850_v18 = vld [vmem:[%s2354_s1 + $0x208] sm:$0xff]   ;;  %v1853_v21 = vld [vmem:[%s2354_s1 + $0x2d0] sm:$0xff]   ;;  %v1856_v24 = vld [vmem:[%s2354_s1 + $0x258] sm:$0xff]  }
  0x1b   :  { %v1851_v19 = vld [vmem:[%s2354_s1 + $0x288] sm:$0xff]   ;;  %v1854_v22 = vld [vmem:[%s2354_s1 + $0x210] sm:$0xff]   ;;  %v1857_v25 = vld [vmem:[%s2354_s1 + $0x2d8] sm:$0xff]  }
  0x1c   :  { %1608 = vmatpush3.bf16.msra.mxu0 %v1798_v26  ;;  %v1855_v23 = vld [vmem:[%s2354_s1 + $0x290] sm:$0xff]   ;;  %v1858_v26 = vld [vmem:[%s2354_s1 + $0x218] sm:$0xff]   ;;  %v1864_v32 = vld [vmem:[%s2354_s1 + $0x268] sm:$0xff]  }
  0x1d   :  { %1630 = vmatpush3.bf16.msra.mxu1 %v1799_v27  ;;  %1609 = vmatprep.subr.bf16.mxu0 %v1800_v28  ;;  %v1859_v27 = vld [vmem:[%s2354_s1 + $0x298] sm:$0xff]   ;;  %v1860_v28 = vld [vmem:[%s2354_s1 + $0x260] sm:$0xff]   ;;  %v1865_v33 = vld [vmem:[%s2354_s1 + $0x2e8] sm:$0xff]  }
  0x1e   :  { %1631 = vmatprep.subr.bf16.mxu1 %v1801_v29  ;;  %v1861_v29 = vld [vmem:[%s2354_s1 + $0x2e0] sm:$0xff]   ;;  %v1867_v35 = vld [vmem:[%s2354_s1 + $0x2a8] sm:$0xff]   ;;  %v1869_v37 = vld [vmem:[%s2354_s1 + $0x2f0] sm:$0xff]  }
  0x1f   :  { %v1900_v6 = vld [vmem:[%s2354_s1 + $0x368] sm:$0xff]  }
  0x20   :  { %1610 = vmatpush3.bf16.msra.mxu0 %v1802_v30  ;;  %v1862_v30 = vld [vmem:[%s2354_s1 + $0x220] sm:$0xff]   ;;  %v1903_v9 = vld [vmem:[%s2354_s1 + $0x3a8] sm:$0xff]  }
  0x21   :  { %1632 = vmatpush3.bf16.msra.mxu1 %v1803_v31  ;;  %1639 = vmatprep.subr.bf16.mxu0 %v1808_v38  ;;  %v1863_v31 = vld [vmem:[%s2354_s1 + $0x2a0] sm:$0xff]   ;;  %v1870_v38 = vld [vmem:[%s2354_s1 + $0x230] sm:$0xff]  }
  0x22   :  { %1661 = vmatprep.subr.bf16.mxu1 %v1809_v39  ;;  %v1871_v39 = vld [vmem:[%s2354_s1 + $0x2b0] sm:$0xff]  }
  0x23   :  { %1143 = vmatmul.mubr.bf16.vlgmr.msra.gmra.mrb[0].mxu0 %v1450_v34  ;;  %v1866_v34 = vld [vmem:[%s2354_s1 + $0x228] sm:$0xff]  }
  0x24   :  { %1183 = vmatmul.mubr.bf16.vlgmr.msra.gmra.mrb[0].mxu1 %v1452_v36  ;;  %1640 = vmatpush3.bf16.msra.mxu0 %v1810_v40  ;;  %v1868_v36 = vld [vmem:[%s2354_s1 + $0x270] sm:$0xff]   ;;  %v1872_v40 = vld [vmem:[%s2354_s1 + $0x278] sm:$0xff]  }
  0x25   :  { %1662 = vmatpush3.bf16.msra.mxu1 %v1811_v41  ;;  %1641 = vmatprep.subr.bf16.mxu0 %v1812_v42  ;;  %v1873_v41 = vld [vmem:[%s2354_s1 + $0x2f8] sm:$0xff]  }
  0x26   :  { %1663 = vmatprep.subr.bf16.mxu1 %v1813_v43  ;;  %1222 = vmatprep.mubr.bf16.mxu0 %v1455_v8  ;;  %v1874_v42 = vld [vmem:[%s2354_s1 + $0x238] sm:$0xff]   ;;  %v1902_v8 = vld [vmem:[%s2354_s1 + $0x328] sm:$0xff]  }
  0x27   :  { %1262 = vmatprep.mubr.bf16.mxu1 %v1457_v11  ;;  %v1875_v43 = vld [vmem:[%s2354_s1 + $0x2b8] sm:$0xff]   ;;  %v1905_v11 = vld [vmem:[%s2354_s1 + $0x3f0] sm:$0xff]  }
  0x28   :  { %1642 = vmatpush3.bf16.msra.mxu0 %v1814_v44  ;;  %v26_v44 = vld [vmem:[%s2355_s0 + $0x20] sm:$0xff] }
  0x29   :  { %1664 = vmatpush3.bf16.msra.mxu1 %v1815_v45  ;;  %1643 = vmatprep.subr.bf16.mxu0 %v1816_v46  ;;  %v27_v45 = vld [vmem:[%s2355_s0 + $0x28] sm:$0xff]  ;;  %v1458_v46 = vcombine.low %v26_v44, %v26_v44 }
  0x2a   :  { %1665 = vmatprep.subr.bf16.mxu1 %v1817_v47  ;;  %v1459_v47 = vcombine.high %v26_v44, %v26_v44 }
  0x2c   :  { %1644 = vmatpush3.bf16.msra.mxu0 %v1818_v48  ;;  %v1460_v48 = vcombine.low %v27_v45, %v27_v45 }
  0x2d   :  { %1666 = vmatpush3.bf16.msra.mxu1 %v1819_v49  ;;  %1645 = vmatprep.subr.bf16.mxu0 %v1820_v50  ;;  %v1461_v49 = vcombine.high %v27_v45, %v27_v45  ;;  %v1880_v50 = vld [vmem:[%s2354_s1 + $0x340] sm:$0xff]  }
  0x2e   :  { %1667 = vmatprep.subr.bf16.mxu1 %v1821_v51  ;;  %v1881_v51 = vld [vmem:[%s2354_s1 + $0x3c0] sm:$0xff]  }
  0x30   :  { %1646 = vmatpush3.bf16.msra.mxu0 %v1822_v52  ;;  %v1882_v52 = vld [vmem:[%s2354_s1 + $0x300] sm:$0xff]  }
  0x31   :  { %1668 = vmatpush3.bf16.msra.mxu1 %v1823_v53  ;;  %1647 = vmatprep.subr.bf16.mxu0 %v1824_v54  ;;  %v1883_v53 = vld [vmem:[%s2354_s1 + $0x380] sm:$0xff]   ;;  %v1884_v54 = vld [vmem:[%s2354_s1 + $0x348] sm:$0xff]  }
  0x32   :  { %1669 = vmatprep.subr.bf16.mxu1 %v1825_v55  ;;  %v1885_v55 = vld [vmem:[%s2354_s1 + $0x3c8] sm:$0xff]  }
  0x34   :  { %1648 = vmatpush3.bf16.msra.mxu0 %v1826_v56  ;;  %v1886_v56 = vld [vmem:[%s2354_s1 + $0x308] sm:$0xff]  }
  0x35   :  { %1670 = vmatpush3.bf16.msra.mxu1 %v1827_v57  ;;  %1649 = vmatprep.subr.bf16.mxu0 %v1828_v58  ;;  %v1887_v57 = vld [vmem:[%s2354_s1 + $0x388] sm:$0xff]   ;;  %v1888_v58 = vld [vmem:[%s2354_s1 + $0x350] sm:$0xff]  }
  0x36   :  { %1671 = vmatprep.subr.bf16.mxu1 %v1829_v59  ;;  %v1889_v59 = vld [vmem:[%s2354_s1 + $0x3d0] sm:$0xff]  }
  0x38   :  { %1650 = vmatpush3.bf16.msra.mxu0 %v1830_v60  ;;  %v1890_v60 = vld [vmem:[%s2354_s1 + $0x310] sm:$0xff]  }
  0x39   :  { %1672 = vmatpush3.bf16.msra.mxu1 %v1831_v61  ;;  %1651 = vmatprep.subr.bf16.mxu0 %v1832_v62  ;;  %v1891_v61 = vld [vmem:[%s2354_s1 + $0x390] sm:$0xff]   ;;  %v1892_v62 = vld [vmem:[%s2354_s1 + $0x358] sm:$0xff]  }
  0x3a   :  { %1673 = vmatprep.subr.bf16.mxu1 %v1833_v63  ;;  %v1893_v63 = vld [vmem:[%s2354_s1 + $0x3d8] sm:$0xff]  }
  0x3c   :  { %1652 = vmatpush3.bf16.msra.mxu0 %v1834_v0  ;;  %v1894_v0 = vld [vmem:[%s2354_s1 + $0x318] sm:$0xff]  }
  0x3d   :  { %1674 = vmatpush3.bf16.msra.mxu1 %v1835_v1  ;;  %1653 = vmatprep.subr.bf16.mxu0 %v1836_v2  ;;  %v1895_v1 = vld [vmem:[%s2354_s1 + $0x398] sm:$0xff]   ;;  %v1896_v2 = vld [vmem:[%s2354_s1 + $0x360] sm:$0xff]  }
  0x3e   :  { %1675 = vmatprep.subr.bf16.mxu1 %v1837_v3  ;;  %v1897_v3 = vld [vmem:[%s2354_s1 + $0x3e0] sm:$0xff]  }
  0x40   :  { %1654 = vmatpush3.bf16.msra.mxu0 %v1838_v4  ;;  %v1898_v4 = vld [vmem:[%s2354_s1 + $0x320] sm:$0xff]  }
  0x41   :  { %1676 = vmatpush3.bf16.msra.mxu1 %v1839_v5  ;;  %1683 = vmatprep.subr.bf16.mxu0 %v1844_v12  ;;  %v1899_v5 = vld [vmem:[%s2354_s1 + $0x3a0] sm:$0xff]   ;;  %v1906_v12 = vld [vmem:[%s2354_s1 + $0x330] sm:$0xff]  }
  0x42   :  { %1705 = vmatprep.subr.bf16.mxu1 %v1845_v13  ;;  %v1907_v13 = vld [vmem:[%s2354_s1 + $0x3b0] sm:$0xff]  }
  0x43   :  { %1223 = vmatmul.mubr.bf16.vlgmr.msra.gmra.mrb[4].mxu0 %v1454_v7  ;;  %v1901_v7 = vld [vmem:[%s2354_s1 + $0x3e8] sm:$0xff]  }
  0x44   :  { %1263 = vmatmul.mubr.bf16.vlgmr.msra.gmra.mrb[4].mxu1 %v1456_v10  ;;  %1684 = vmatpush3.bf16.msra.mxu0 %v1846_v14  ;;  %v1904_v10 = vld [vmem:[%s2354_s1 + $0x370] sm:$0xff]   ;;  %v1908_v14 = vld [vmem:[%s2354_s1 + $0x378] sm:$0xff]  }
  0x45   :  { %1706 = vmatpush3.bf16.msra.mxu1 %v1847_v15  ;;  %1685 = vmatprep.subr.bf16.mxu0 %v1848_v16  ;;  %v1909_v15 = vld [vmem:[%s2354_s1 + $0x3f8] sm:$0xff]  }
  0x46   :  { %1707 = vmatprep.subr.bf16.mxu1 %v1849_v17  ;;  %1302 = vmatprep.mubr.bf16.mxu0 %v1459_v47  ;;  %v1910_v16 = vld [vmem:[%s2354_s1 + $0x338] sm:$0xff]  }
  0x47   :  { %1342 = vmatprep.mubr.bf16.mxu1 %v1461_v49  ;;  %v1911_v17 = vld [vmem:[%s2354_s1 + $0x3b8] sm:$0xff]  }
  0x48   :  { %1686 = vmatpush3.bf16.msra.mxu0 %v1850_v18  ;;  %v28_v18 = vld [vmem:[%s2355_s0 + $0x30] sm:$0xff] }
  0x49   :  { %1708 = vmatpush3.bf16.msra.mxu1 %v1851_v19  ;;  %1687 = vmatprep.subr.bf16.mxu0 %v1852_v20  ;;  %v29_v19 = vld [vmem:[%s2355_s0 + $0x38] sm:$0xff]  ;;  %v1462_v20 = vcombine.low %v28_v18, %v28_v18 }
  0x4a   :  { %1709 = vmatprep.subr.bf16.mxu1 %v1853_v21  ;;  %v1463_v21 = vcombine.high %v28_v18, %v28_v18 }
  0x4c   :  { %1688 = vmatpush3.bf16.msra.mxu0 %v1854_v22  ;;  %v1464_v22 = vcombine.low %v29_v19, %v29_v19 }
  0x4d   :  { %1710 = vmatpush3.bf16.msra.mxu1 %v1855_v23  ;;  %1689 = vmatprep.subr.bf16.mxu0 %v1856_v24  ;;  %v1465_v23 = vcombine.high %v29_v19, %v29_v19  ;;  %v1916_v24 = vmov 0.0  }
  0x4e   :  { %1711 = vmatprep.subr.bf16.mxu1 %v1857_v25  ;;  %20 = vst.msk [vmem:[#allocation2] sm:$0xff] %vm19_vm0, %v1916_v24 }
  0x50   :  { %1690 = vmatpush3.bf16.msra.mxu0 %v1858_v26 }
  0x51   :  { %1712 = vmatpush3.bf16.msra.mxu1 %v1859_v27  ;;  %1691 = vmatprep.subr.bf16.mxu0 %v1860_v28 }
  0x52   :  { %1713 = vmatprep.subr.bf16.mxu1 %v1861_v29 }
  0x54   :  { %1692 = vmatpush3.bf16.msra.mxu0 %v1862_v30 }
  0x55   :  { %1714 = vmatpush3.bf16.msra.mxu1 %v1863_v31  ;;  %1693 = vmatprep.subr.bf16.mxu0 %v1864_v32 }
  0x56   :  { %1715 = vmatprep.subr.bf16.mxu1 %v1865_v33 }
  0x58   :  { %1694 = vmatpush3.bf16.msra.mxu0 %v1866_v34 }
  0x59   :  { %1716 = vmatpush3.bf16.msra.mxu1 %v1867_v35  ;;  %1695 = vmatprep.subr.bf16.mxu0 %v1868_v36 }
  0x5a   :  { %1717 = vmatprep.subr.bf16.mxu1 %v1869_v37 }
  0x5c   :  { %1696 = vmatpush3.bf16.msra.mxu0 %v1870_v38 }
  0x5d   :  { %1718 = vmatpush3.bf16.msra.mxu1 %v1871_v39  ;;  %1697 = vmatprep.subr.bf16.mxu0 %v1872_v40 }
  0x5e   :  { %1719 = vmatprep.subr.bf16.mxu1 %v1873_v41 }
  0x60   :  { %1698 = vmatpush3.bf16.msra.mxu0 %v1874_v42 }
  0x61   :  { %1720 = vmatpush3.bf16.msra.mxu1 %v1875_v43  ;;  %1727 = vmatprep.subr.bf16.mxu0 %v1880_v50 }
  0x62   :  { %1749 = vmatprep.subr.bf16.mxu1 %v1881_v51 }
  0x63   :  { %1303 = vmatmul.mubr.bf16.vlgmr.msra.gmra.mrb[8].mxu0 %v1458_v46 }
  0x64   :  { %1343 = vmatmul.mubr.bf16.vlgmr.msra.gmra.mrb[8].mxu1 %v1460_v48  ;;  %1728 = vmatpush3.bf16.msra.mxu0 %v1882_v52 }
  0x65   :  { %1750 = vmatpush3.bf16.msra.mxu1 %v1883_v53  ;;  %1729 = vmatprep.subr.bf16.mxu0 %v1884_v54 }
  0x66   :  { %1751 = vmatprep.subr.bf16.mxu1 %v1885_v55  ;;  %1382 = vmatprep.mubr.bf16.mxu0 %v1463_v21 }
  0x67   :  { %1422 = vmatprep.mubr.bf16.mxu1 %v1465_v23 }
  0x68   :  { %1730 = vmatpush3.bf16.msra.mxu0 %v1886_v56 }
  0x69   :  { %1752 = vmatpush3.bf16.msra.mxu1 %v1887_v57  ;;  %1731 = vmatprep.subr.bf16.mxu0 %v1888_v58 }
  0x6a   :  { %1753 = vmatprep.subr.bf16.mxu1 %v1889_v59 }
  0x6c   :  { %1732 = vmatpush3.bf16.msra.mxu0 %v1890_v60 }
  0x6d   :  { %1754 = vmatpush3.bf16.msra.mxu1 %v1891_v61  ;;  %1733 = vmatprep.subr.bf16.mxu0 %v1892_v62 }
  0x6e   :  { %1755 = vmatprep.subr.bf16.mxu1 %v1893_v63 }
  0x70   :  { %1734 = vmatpush3.bf16.msra.mxu0 %v1894_v0 }
  0x71   :  { %1756 = vmatpush3.bf16.msra.mxu1 %v1895_v1  ;;  %1735 = vmatprep.subr.bf16.mxu0 %v1896_v2 }
  0x72   :  { %1757 = vmatprep.subr.bf16.mxu1 %v1897_v3 }
  0x74   :  { %1736 = vmatpush3.bf16.msra.mxu0 %v1898_v4 }
  0x75   :  { %1758 = vmatpush3.bf16.msra.mxu1 %v1899_v5  ;;  %1737 = vmatprep.subr.bf16.mxu0 %v1900_v6 }
  0x76   :  { %1759 = vmatprep.subr.bf16.mxu1 %v1901_v7  ;;  %v21_v7 = vld [vmem:[#allocation2] sm:$0xff] }
  0x78   :  { %1738 = vmatpush3.bf16.msra.mxu0 %v1902_v8 }
  0x79   :  { %1760 = vmatpush3.bf16.msra.mxu1 %v1903_v9  ;;  %1739 = vmatprep.subr.bf16.mxu0 %v1904_v10  ;;  %v1594_v10 = vld [vmem:[%s2356_s2] ss:$0 sm:$0xff] }
  0x7a   :  { %1761 = vmatprep.subr.bf16.mxu1 %v1905_v11 }
  0x7c   :  { %1740 = vmatpush3.bf16.msra.mxu0 %v1906_v12 }
  0x7d   :  { %1762 = vmatpush3.bf16.msra.mxu1 %v1907_v13  ;;  %1741 = vmatprep.subr.bf16.mxu0 %v1908_v14 }
  0x7e   :  { %1763 = vmatprep.subr.bf16.mxu1 %v1909_v15 }
  0x80   :  { %1742 = vmatpush3.bf16.msra.mxu0 %v1910_v16 }
  0x81   :  { %1764 = vmatpush3.bf16.msra.mxu1 %v1911_v17 }
  0x83   :  { %1383 = vmatmul.mubr.bf16.vlgmr.msra.gmra.mrb[12].mxu0 %v1462_v20 }
  0x84   :  { %1423 = vmatmul.mubr.bf16.vlgmr.msra.gmra.mrb[12].mxu1 %v1464_v22 }
  0xf6   :  { %v1611_v25 = vpop.f32.mrb[0].mxu0 }
  0xf7   :  { %v1633_v26 = vpop.f32.mrb[0].mxu1  ;;  %v1612_v27 = vpop.f32.mrb[1].mxu0 }
  0xf8   :  { %v1634_v28 = vpop.f32.mrb[1].mxu1  ;;  %v1613_v29 = vadd.f32 %v1612_v27, %v1611_v25  ;;  %v1614_v31 = vpop.f32.mrb[2].mxu0 }
  0xf9   :  { %v1635_v30 = vadd.f32 %v1634_v28, %v1633_v26  ;;  %v1636_v32 = vpop.f32.mrb[2].mxu1  ;;  %v1615_v33 = vpop.f32.mrb[3].mxu0 }
  0xfa   :  { %v1637_v34 = vpop.f32.mrb[3].mxu1 }
  0xfb   :  { %v1185_v35 = vadd.f32 %v1635_v30, %v1613_v29 }
 0x116   :  { %v1655_v36 = vpop.f32.mrb[4].mxu0 }
 0x117   :  { %v1677_v37 = vpop.f32.mrb[4].mxu1  ;;  %v1656_v38 = vpop.f32.mrb[5].mxu0 }
 0x118   :  { %v1678_v39 = vpop.f32.mrb[5].mxu1  ;;  %v1657_v40 = vadd.f32 %v1656_v38, %v1655_v36  ;;  %v1658_v42 = vpop.f32.mrb[6].mxu0 }
 0x119   :  { %v1679_v41 = vadd.f32 %v1678_v39, %v1677_v37  ;;  %v1680_v43 = vpop.f32.mrb[6].mxu1  ;;  %v1659_v44 = vpop.f32.mrb[7].mxu0 }
 0x11a   :  { %v1681_v45 = vpop.f32.mrb[7].mxu1  ;;  %v1225_v46 = vadd.f32 %v1657_v40, %v1185_v35 }
 0x11c   :  { %v1265_v47 = vadd.f32 %v1679_v41, %v1225_v46 }
 0x136   :  { %v1699_v48 = vpop.f32.mrb[8].mxu0 }
 0x137   :  { %v1721_v49 = vpop.f32.mrb[8].mxu1  ;;  %v1700_v50 = vpop.f32.mrb[9].mxu0 }
 0x138   :  { %v1701_v51 = vadd.f32 %v1700_v50, %v1699_v48  ;;  %v1722_v52 = vpop.f32.mrb[9].mxu1  ;;  %v1702_v53 = vpop.f32.mrb[10].mxu0 }
 0x139   :  { %v1723_v54 = vadd.f32 %v1722_v52, %v1721_v49  ;;  %v1724_v55 = vpop.f32.mrb[10].mxu1  ;;  %v1703_v56 = vpop.f32.mrb[11].mxu0 }
 0x13a   :  { %v1305_v57 = vadd.f32 %v1701_v51, %v1265_v47  ;;  %v1725_v58 = vpop.f32.mrb[11].mxu1 }
 0x13c   :  { %v1345_v59 = vadd.f32 %v1723_v54, %v1305_v57 }
 0x156   :  { %v1743_v60 = vpop.f32.mrb[12].mxu0 }
 0x157   :  { %v1765_v61 = vpop.f32.mrb[12].mxu1  ;;  %v1744_v62 = vpop.f32.mrb[13].mxu0 }
 0x158   :  { %v1745_v63 = vadd.f32 %v1744_v62, %v1743_v60  ;;  %v1766_v0 = vpop.f32.mrb[13].mxu1  ;;  %v1746_v1 = vpop.f32.mrb[14].mxu0 }
 0x159   :  { %v1767_v2 = vadd.f32 %v1766_v0, %v1765_v61  ;;  %v1768_v3 = vpop.f32.mrb[14].mxu1  ;;  %v1747_v4 = vpop.f32.mrb[15].mxu0 }
 0x15a   :  { %v1385_v5 = vadd.f32 %v1745_v63, %v1345_v59  ;;  %v1769_v6 = vpop.f32.mrb[15].mxu1 }
 0x15c   :  { %v1425_v8 = vadd.f32 %v1767_v2, %v1385_v5 }
 0x15e   :  { %v1430_v9 = vadd.f32 %v1425_v8, %v21_v7 }
 0x160   :  { %1432 = vst.msk [vmem:[#allocation2] sm:$0xff] %vm19_vm0, %v1430_v9 }
 0x167   :  { %v1436_v11 = vld [vmem:[#allocation2] sm:$0xff] }
 0x168   :  { %v1444_v12 = vadd.f32 %v1594_v10, %v1436_v11 }
 0x16a   :  { %1445 = vst.msk [vmem:[%s2357_s3] sm:$0xff] %vm19_vm0, %v1444_v12 }

</bundles_post_ra>
